<compile_context>
chip_gen: v7x
topology: tpu7x:2x2x1
jax: 0.10.0
libtpu: 0.0.40
codegen_flags: <defaults>
</compile_context>

<pallas_src>
import functools

import jax
import jax.numpy as jnp
from jax import lax
from jax.experimental import pallas as pl
from jax.experimental.pallas import tpu as pltpu


def _unit2mel_kernel(rows_ref,   # scalar prefetch: (B*T_pad,) int32 in SMEM (pre-clamped hubert row ids)
                     units_hbm,  # (B, Tu, C) f32 in HBM (memory_space=pl.ANY)
                     aux_ref,    # (3, tile_t) f32: rows = [f0, volume, unit-mask]
                     wu_ref,     # (H, C) f32|bf16  unit_embed weight
                     wf_ref,     # (H, 1) f32       f0_embed weight column
                     wv_ref,     # (H, 1) f32       volume_embed weight column
                     gb_ref,     # (H, tile_t) f32  speaker mix + folded biases
                     out_ref,    # (H, tile_t)
                     gbuf,       # scratch (tile_t, C) f32: gathered hubert rows
                     sem,        # scalar DMA semaphore
                     *, t_pad, tile_t):
    t = pl.program_id(0)
    b = pl.program_id(1)
    base = b * t_pad + t * tile_t

    # ---- DMA row gather (HBM -> VMEM): gbuf[i, :] = units[b, rows[base+i], :] ----
    # All tile_t row copies are issued up front on the DMA engine (not the
    # vld/vst VLIW slots); the gather-independent work below overlaps their
    # latency; the semaphore is drained before gbuf is read.  Every row of
    # gbuf is rewritten each grid step, so no zero-init is needed.
    def _start(i, carry):
        row = rows_ref[base + i]
        pltpu.make_async_copy(units_hbm.at[b, pl.ds(row, 1), :],
                              gbuf.at[pl.ds(i, 1), :], sem).start()
        return carry
    lax.fori_loop(0, tile_t, _start, 0)

    # ---- gather-independent terms (overlap with the DMAs) ----
    a = aux_ref[...]                        # (3, tile_t)
    f0 = a[0:1, :]                          # (1, tile_t)
    vol = a[1:2, :]
    msk = a[2:3, :]                         # 1.0 where mel2ph > 0 (and frame < T) else 0.0
    # (H,1) x (1,tile_t) outer-product adds, already in output orientation.
    rest = wf_ref[...] * jnp.log(1.0 + f0 * (1.0 / 700.0))
    rest = rest + wv_ref[...] * vol
    rest = rest + gb_ref[...]               # speaker mix + (unit_b + f0_b + vol_b)

    # ---- drain the gather ----
    def _wait(i, carry):
        pltpu.make_async_copy(units_hbm.at[b, pl.ds(0, 1), :],
                              gbuf.at[pl.ds(i, 1), :], sem).wait()
        return carry
    lax.fori_loop(0, tile_t, _wait, 0)

    # ---- unit_embed matmul in (H, tile_t) orientation (lane-dense output) ----
    gathered = gbuf[...].astype(wu_ref.dtype)           # bf16 cast only if enabled
    xu = lax.dot_general(wu_ref[...], gathered, (((1,), (1,)), ((), ())),
                         preferred_element_type=jnp.float32)   # (H, tile_t)
    # mel2ph == 0 selects the implicit zero row of F.pad(units, [0,0,1,0]):
    # zero only the W @ x contribution for those frames (bias stays, as in torch).
    out_ref[...] = (xu * msk + rest).astype(out_ref.dtype)


def unit2mel_forward(units, mel2ph, f0, volume, spk_mix, params, *,
                     tile_t=256, use_bf16_matmul=True, out_dtype=jnp.float32):
    """units (B,Tu,C) f32, mel2ph (B,T) i32, f0/volume (B,T) f32, spk_mix (T,n_spk) f32."""
    B, Tu, C = units.shape
    T = mel2ph.shape[1]
    H = params["unit_w"].shape[0]
    assert tile_t % 128 == 0, "tile_t must be a multiple of 128 (lane-dense stores)"

    T_pad = -(-T // tile_t) * tile_t
    pad = T_pad - T
    n_t = T_pad // tile_t

    # mel2ph -> (a) SMEM row table for the DMA gather, (b) f32 mask for the zero row.
    # NOTE: indices are clamped to [0, Tu]; out-of-range values map to valid rows
    # instead of erroring like torch.gather would (known, documented deviation).
    m = jnp.pad(jnp.clip(mel2ph.astype(jnp.int32), 0, Tu), ((0, 0), (0, pad)))  # (B, T_pad)
    rows_flat = (jnp.maximum(m, 1) - 1).reshape(-1)                              # (B*T_pad,)
    unit_mask = (m > 0).astype(jnp.float32)                                      # (B, T_pad)

    # Lane-dense per-frame scalars, merged into one (B, 3, T_pad) input.
    f0_p = jnp.pad(f0.astype(jnp.float32), ((0, 0), (0, pad)))
    vol_p = jnp.pad(volume.astype(jnp.float32), ((0, 0), (0, pad)))
    aux = jnp.stack([f0_p, vol_p, unit_mask], axis=1)                             # (B, 3, T_pad)

    # Batch-invariant terms hoisted out of the kernel (spk_mix has no batch dim
    # in this module's forward): g (H,T) = (spk_mix @ speaker_map)^T + biases.
    spk_p = jnp.pad(spk_mix.astype(jnp.float32), ((0, pad), (0, 0)))              # (T_pad, n_spk)
    gmel = spk_p @ params["speaker_map"].astype(jnp.float32)                      # (T_pad, H)
    b_tot = (params["unit_b"] + params["f0_b"] + params["vol_b"]).astype(jnp.float32)
    gb = gmel.T + b_tot[:, None]                                                  # (H, T_pad)

    w_dtype = jnp.bfloat16 if use_bf16_matmul else jnp.float32
    wu = params["unit_w"].astype(w_dtype)                                         # (H, C), cast once
    wf = params["f0_w"].reshape(H, 1).astype(jnp.float32)
    wv = params["vol_w"].reshape(H, 1).astype(jnp.float32)
    units_f32 = units.astype(jnp.float32)                                         # stays in HBM

    # Derived VMEM budget (double-buffered blocks + gather scratch), with
    # headroom, capped safely under v7x's 64 MiB physical ceiling.
    blk_bytes = (2 * (3 * tile_t * 4)             # aux
                 + 2 * (H * tile_t * 4)           # gb
                 + 2 * (H * tile_t * 4)           # out
                 + 2 * (H * C * (2 if use_bf16_matmul else 4) + 2 * H * 4)  # weights
                 + tile_t * C * 4)                # gather scratch
    vmem_limit = int(min(max(2 * blk_bytes + (4 << 20), 16 << 20), 48 << 20))

    kernel = functools.partial(_unit2mel_kernel, t_pad=T_pad, tile_t=tile_t)

    out = pl.pallas_call(
        kernel,
        out_shape=jax.ShapeDtypeStruct((B, H, T_pad), out_dtype),
        grid_spec=pltpu.PrefetchScalarGridSpec(
            num_scalar_prefetch=1,
            grid=(n_t, B),   # frame-tile axis leading: sharded even for B=1 inference
            in_specs=[
                pl.BlockSpec(memory_space=pl.ANY),                               # units (HBM)
                pl.BlockSpec((None, 3, tile_t), lambda t, b, rows: (b, 0, t)),   # aux
                pl.BlockSpec((H, C), lambda t, b, rows: (0, 0)),                 # unit_embed W
                pl.BlockSpec((H, 1), lambda t, b, rows: (0, 0)),                 # f0_embed w
                pl.BlockSpec((H, 1), lambda t, b, rows: (0, 0)),                 # volume_embed w
                pl.BlockSpec((H, tile_t), lambda t, b, rows: (0, t)),            # spk mix + biases
            ],
            out_specs=pl.BlockSpec((None, H, tile_t), lambda t, b, rows: (b, 0, t)),
            scratch_shapes=[pltpu.VMEM((tile_t, C), jnp.float32),
                            pltpu.SemaphoreType.DMA(())],
        ),
        compiler_params=pltpu.CompilerParams(
            dimension_semantics=("parallel", "parallel"),
            vmem_limit_bytes=vmem_limit,
        ),
    )(rows_flat, units_f32, aux, wu, wf, wv, gb)

    return out[:, :, :T]


def ref_forward(units, mel2ph, f0, volume, spk_mix, params):
    """Pure-JAX reference mirroring the PyTorch forward (n_spk > 1 branch)."""
    dec_inp = jnp.pad(units, ((0, 0), (1, 0), (0, 0)))                        # (B, Tu+1, C)
    gathered = jax.vmap(lambda d, m: d[m])(dec_inp, mel2ph)                   # (B, T, C)
    x = jnp.einsum("btc,hc->bth", gathered, params["unit_w"],
                   precision=jax.lax.Precision.HIGHEST) + params["unit_b"]
    x = x + jnp.log(1.0 + f0[..., None] / 700.0) * params["f0_w"].reshape(1, 1, -1) + params["f0_b"]
    x = x + volume[..., None] * params["vol_w"].reshape(1, 1, -1) + params["vol_b"]
    g = spk_mix @ params["speaker_map"]                                       # (T, H)
    return jnp.transpose(x, (0, 2, 1)) + g.T[None]                            # (B, H, T)


if __name__ == "__main__":
    # Small shapes consistent with the module (hubert frames < mel frames):
    B, Tu, T = 2, 24, 300        # batch, hubert frames, mel frames
    C, H, n_spk = 128, 128, 4    # input_channel, n_hidden, n_spk

    key = jax.random.PRNGKey(0)
    ks = jax.random.split(key, 10)

    units = jax.random.normal(ks[0], (B, Tu, C), dtype=jnp.float32)
    mel2ph = jax.random.randint(ks[1], (B, T), 0, Tu + 1, dtype=jnp.int32)    # 0 == pad row
    f0 = jax.random.uniform(ks[2], (B, T), jnp.float32, 80.0, 400.0)
    volume = jax.random.uniform(ks[3], (B, T), jnp.float32, 0.0, 1.0)
    spk_mix = jax.random.uniform(ks[4], (T, n_spk), jnp.float32, 0.0, 1.0)
    spk_mix = spk_mix / jnp.sum(spk_mix, axis=-1, keepdims=True)

    params = {
        "unit_w": 0.05 * jax.random.normal(ks[5], (H, C), dtype=jnp.float32),
        "unit_b": 0.01 * jax.random.normal(ks[6], (H,), dtype=jnp.float32),
        "f0_w": 0.05 * jax.random.normal(ks[7], (H,), dtype=jnp.float32),
        "f0_b": jnp.zeros((H,), jnp.float32),
        "vol_w": 0.05 * jax.random.normal(ks[8], (H,), dtype=jnp.float32),
        "vol_b": jnp.zeros((H,), jnp.float32),
        # speaker_map as produced by init_spkembed: one embedding row per speaker
        "speaker_map": 0.05 * jax.random.normal(ks[9], (n_spk, H), dtype=jnp.float32),
    }

    ref = ref_forward(units, mel2ph, f0, volume, spk_mix, params)

    # f32 MXU path (tight tolerance)
    out_f32 = unit2mel_forward(units, mel2ph, f0, volume, spk_mix, params,
                               use_bf16_matmul=False)
    out_f32 = jax.block_until_ready(out_f32)
    assert out_f32.shape == (B, H, T)
    assert jnp.allclose(out_f32, ref, atol=1e-4, rtol=1e-4), "f32 path mismatch"

    # bf16 MXU path (default; f32 accumulation)
    out_bf16 = unit2mel_forward(units, mel2ph, f0, volume, spk_mix, params,
                                use_bf16_matmul=True)
    out_bf16 = jax.block_until_ready(out_bf16)
    assert out_bf16.shape == (B, H, T)
    assert jnp.allclose(out_bf16, ref, atol=3e-2, rtol=3e-2), "bf16 path mismatch"

    print("KERNEL_OK")
</pallas_src>

<mosaic_0001>
module attributes {stable_mosaic.version = 11 : i64} {
  func.func @_unit2mel_kernel(%arg0: i32, %arg1: i32, %arg2: memref<1024xi32, #tpu.memory_space<smem>>, %arg3: memref<2x24x128xf32, #tpu.memory_space<any>>, %arg4: memref<1x3x256xf32, #tpu.memory_space<vmem>>, %arg5: memref<128x128xf32, #tpu.memory_space<vmem>>, %arg6: memref<128x1xf32, #tpu.memory_space<vmem>>, %arg7: memref<128x1xf32, #tpu.memory_space<vmem>>, %arg8: memref<128x256xf32, #tpu.memory_space<vmem>>, %arg9: memref<1x128x256xf32, #tpu.memory_space<vmem>>, %arg10: memref<256x128xf32, #tpu.memory_space<vmem>>, %arg11: memref<!tpu.dma_semaphore, #tpu.memory_space<semaphore_mem>>) attributes {dimension_semantics = [#tpu.dimension_semantics<parallel>, #tpu.dimension_semantics<parallel>], iteration_bounds = array<i64: 2, 2>, scalar_prefetch = 1 : i64, scratch_operands = 2 : i64, tpu.core_type = #tpu.core_type<tc>, window_params = [{}, {transform_indices = @transform_1, window_bounds = array<i64: 1, 3, 256>}, {pipeline_mode = #tpu.pipeline_mode<synchronous>, transform_indices = @transform_2, window_bounds = array<i64: 128, 128>}, {pipeline_mode = #tpu.pipeline_mode<synchronous>, transform_indices = @transform_3, window_bounds = array<i64: 128, 1>}, {pipeline_mode = #tpu.pipeline_mode<synchronous>, transform_indices = @transform_4, window_bounds = array<i64: 128, 1>}, {transform_indices = @transform_5, window_bounds = array<i64: 128, 256>}, {transform_indices = @transform_6, window_bounds = array<i64: 1, 128, 256>}]} {
    %c512_i32 = arith.constant 512 : i32
    %0 = arith.muli %arg1, %c512_i32 : i32
    %c256_i32 = arith.constant 256 : i32
    %1 = arith.muli %arg0, %c256_i32 : i32
    %2 = arith.addi %0, %1 : i32
    %c0_i32 = arith.constant 0 : i32
    %c256_i32_0 = arith.constant 256 : i32
    %3 = arith.addi %c0_i32, %c256_i32_0 : i32
    %c1_i32 = arith.constant 1 : i32
    scf.for %arg12 = %c0_i32 to %3 step %c1_i32  : i32 {
      %35 = arith.addi %2, %arg12 : i32
      %36 = arith.index_cast %35 : i32 to index
      %37 = memref.load %arg2[%36] : memref<1024xi32, #tpu.memory_space<smem>>
      %c0_i32_23 = arith.constant 0 : i32
      %38 = tpu.memref_slice %arg3[%arg1, %37, %c0_i32_23] : memref<2x24x128xf32, #tpu.memory_space<any>> -> memref<1x1x128xf32, #tpu.memory_space<any>>
      %39 = tpu.memref_squeeze %38 : memref<1x1x128xf32, #tpu.memory_space<any>> -> memref<1x128xf32, #tpu.memory_space<any>>
      %c0_i32_24 = arith.constant 0 : i32
      %40 = tpu.memref_slice %arg10[%arg12, %c0_i32_24] : memref<256x128xf32, #tpu.memory_space<vmem>> -> memref<1x128xf32, #tpu.memory_space<vmem>>
      tpu.enqueue_dma source(%39 : memref<1x128xf32, #tpu.memory_space<any>>) target(%40 : memref<1x128xf32, #tpu.memory_space<vmem>>) target_semaphore(%arg11 : memref<!tpu.dma_semaphore, #tpu.memory_space<semaphore_mem>>)
    }
    %c256_i32_1 = arith.constant 256 : i32
    %c0 = arith.constant 0 : index
    %c0_2 = arith.constant 0 : index
    %c0_3 = arith.constant 0 : index
    %4 = vector.load %arg4[%c0, %c0_2, %c0_3] : memref<1x3x256xf32, #tpu.memory_space<vmem>>, vector<1x3x256xf32>
    %5 = vector.shape_cast %4 : vector<1x3x256xf32> to vector<3x256xf32>
    %6 = vector.extract_strided_slice %5 {offsets = [0, 0], sizes = [1, 256], strides = [1, 1]} : vector<3x256xf32> to vector<1x256xf32>
    %7 = vector.extract_strided_slice %5 {offsets = [1, 0], sizes = [1, 256], strides = [1, 1]} : vector<3x256xf32> to vector<1x256xf32>
    %8 = vector.extract_strided_slice %5 {offsets = [2, 0], sizes = [1, 256], strides = [1, 1]} : vector<3x256xf32> to vector<1x256xf32>
    %c0_4 = arith.constant 0 : index
    %c0_5 = arith.constant 0 : index
    %9 = vector.load %arg6[%c0_4, %c0_5] : memref<128x1xf32, #tpu.memory_space<vmem>>, vector<128x1xf32>
    %cst = arith.constant 0.00142857141 : f32
    %10 = vector.broadcast %cst : f32 to vector<1x256xf32>
    %11 = arith.mulf %6, %10 : vector<1x256xf32>
    %cst_6 = arith.constant 1.000000e+00 : f32
    %12 = vector.broadcast %cst_6 : f32 to vector<1x256xf32>
    %13 = arith.addf %12, %11 : vector<1x256xf32>
    %14 = math.log %13 : vector<1x256xf32>
    %15 = vector.broadcast %9 : vector<128x1xf32> to vector<128x256xf32>
    %16 = vector.broadcast %14 : vector<1x256xf32> to vector<128x256xf32>
    %17 = arith.mulf %15, %16 : vector<128x256xf32>
    %c0_7 = arith.constant 0 : index
    %c0_8 = arith.constant 0 : index
    %18 = vector.load %arg7[%c0_7, %c0_8] : memref<128x1xf32, #tpu.memory_space<vmem>>, vector<128x1xf32>
    %19 = vector.broadcast %18 : vector<128x1xf32> to vector<128x256xf32>
    %20 = vector.broadcast %7 : vector<1x256xf32> to vector<128x256xf32>
    %21 = arith.mulf %19, %20 : vector<128x256xf32>
    %22 = arith.addf %17, %21 : vector<128x256xf32>
    %c0_9 = arith.constant 0 : index
    %c0_10 = arith.constant 0 : index
    %23 = vector.load %arg8[%c0_9, %c0_10] : memref<128x256xf32, #tpu.memory_space<vmem>>, vector<128x256xf32>
    %24 = arith.addf %22, %23 : vector<128x256xf32>
    %c0_i32_11 = arith.constant 0 : i32
    %c256_i32_12 = arith.constant 256 : i32
    %25 = arith.addi %c0_i32_11, %c256_i32_12 : i32
    %c1_i32_13 = arith.constant 1 : i32
    scf.for %arg12 = %c0_i32_11 to %25 step %c1_i32_13  : i32 {
      %c0_i32_23 = arith.constant 0 : i32
      %c0_i32_24 = arith.constant 0 : i32
      %35 = tpu.memref_slice %arg3[%arg1, %c0_i32_23, %c0_i32_24] : memref<2x24x128xf32, #tpu.memory_space<any>> -> memref<1x1x128xf32, #tpu.memory_space<any>>
      %36 = tpu.memref_squeeze %35 : memref<1x1x128xf32, #tpu.memory_space<any>> -> memref<1x128xf32, #tpu.memory_space<any>>
      %c0_i32_25 = arith.constant 0 : i32
      %37 = tpu.memref_slice %arg10[%arg12, %c0_i32_25] : memref<256x128xf32, #tpu.memory_space<vmem>> -> memref<1x128xf32, #tpu.memory_space<vmem>>
      tpu.wait_dma2 semaphore(%arg11 : memref<!tpu.dma_semaphore, #tpu.memory_space<semaphore_mem>>) src(%36 : memref<1x128xf32, #tpu.memory_space<any>>) dst(%37 : memref<1x128xf32, #tpu.memory_space<vmem>>)
    }
    %c256_i32_14 = arith.constant 256 : i32
    %c0_15 = arith.constant 0 : index
    %c0_16 = arith.constant 0 : index
    %26 = vector.load %arg10[%c0_15, %c0_16] : memref<256x128xf32, #tpu.memory_space<vmem>>, vector<256x128xf32>
    %c0_17 = arith.constant 0 : index
    %c0_18 = arith.constant 0 : index
    %27 = vector.load %arg5[%c0_17, %c0_18] : memref<128x128xf32, #tpu.memory_space<vmem>>, vector<128x128xf32>
    %cst_19 = arith.constant dense<0.000000e+00> : vector<128x256xf32>
    %28 = tpu.matmul %27, %26, %cst_19 {dimension_numbers = #tpu.dot_dimension_numbers<[1], [1], [0], [0], [0, 0, 1, 0], [], []>} : vector<128x128xf32>, vector<256x128xf32>, vector<128x256xf32> -> vector<128x256xf32>
    %29 = vector.broadcast %8 : vector<1x256xf32> to vector<128x256xf32>
    %30 = arith.mulf %28, %29 : vector<128x256xf32>
    %31 = arith.addf %30, %24 : vector<128x256xf32>
    %c0_20 = arith.constant 0 : index
    %c0_21 = arith.constant 0 : index
    %c0_22 = arith.constant 0 : index
    %32 = vector.load %arg9[%c0_20, %c0_21, %c0_22] : memref<1x128x256xf32, #tpu.memory_space<vmem>>, vector<1x128x256xf32>
    %33 = vector.shape_cast %32 : vector<1x128x256xf32> to vector<128x256xf32>
    %34 = vector.shape_cast %31 : vector<128x256xf32> to vector<1x128x256xf32>
    tpu.vector_store %arg9[%c0_20, %c0_21, %c0_22], %34 {strides = array<i32>} : memref<1x128x256xf32, #tpu.memory_space<vmem>>, vector<1x128x256xf32>,
    return
  }
  func.func @transform_1(%arg0: i32, %arg1: i32, %arg2: memref<1024xi32, #tpu.memory_space<smem>>) -> (i32, i32, i32) {
    %c0_i32 = arith.constant 0 : i32
    %c0_i32_0 = arith.constant 0 : i32
    return %arg1, %c0_i32, %arg0 : i32, i32, i32
  }
  func.func @transform_2(%arg0: i32, %arg1: i32, %arg2: memref<1024xi32, #tpu.memory_space<smem>>) -> (i32, i32) {
    %c0_i32 = arith.constant 0 : i32
    %c0_i32_0 = arith.constant 0 : i32
    %c0_i32_1 = arith.constant 0 : i32
    return %c0_i32, %c0_i32_0 : i32, i32
  }
  func.func @transform_3(%arg0: i32, %arg1: i32, %arg2: memref<1024xi32, #tpu.memory_space<smem>>) -> (i32, i32) {
    %c0_i32 = arith.constant 0 : i32
    %c0_i32_0 = arith.constant 0 : i32
    %c0_i32_1 = arith.constant 0 : i32
    return %c0_i32, %c0_i32_0 : i32, i32
  }
  func.func @transform_4(%arg0: i32, %arg1: i32, %arg2: memref<1024xi32, #tpu.memory_space<smem>>) -> (i32, i32) {
    %c0_i32 = arith.constant 0 : i32
    %c0_i32_0 = arith.constant 0 : i32
    %c0_i32_1 = arith.constant 0 : i32
    return %c0_i32, %c0_i32_0 : i32, i32
  }
  func.func @transform_5(%arg0: i32, %arg1: i32, %arg2: memref<1024xi32, #tpu.memory_space<smem>>) -> (i32, i32) {
    %c0_i32 = arith.constant 0 : i32
    %c0_i32_0 = arith.constant 0 : i32
    return %c0_i32, %arg0 : i32, i32
  }
  func.func @transform_6(%arg0: i32, %arg1: i32, %arg2: memref<1024xi32, #tpu.memory_space<smem>>) -> (i32, i32, i32) {
    %c0_i32 = arith.constant 0 : i32
    %c0_i32_0 = arith.constant 0 : i32
    return %arg1, %c0_i32, %arg0 : i32, i32, i32
  }
}

</mosaic_0001>

<bundles_post_ra>
// kernel: tpu_custom_call.1
= control target key start
LH: loop header
LB: loop body
LE: loop exit
PB: predicated region body
PF: predicated region fallthrough
CT: control target
= control target key end

     0   :  { %s2474_s0 = inlined_call_operand.vmem [shape: s32[1024], index: 0, kind: input, shape index: {}]   ;;  %s2475_s1 = inlined_call_operand.vmem [shape: f32[2,24,128], index: 1, kind: input, shape index: {}]   ;;  %s2476_s2 = inlined_call_operand.vmem [shape: f32[2,3,512], index: 2, kind: input, shape index: {}]   ;;  %s2477_s3 = inlined_call_operand.vmem [shape: f32[128,128], index: 3, kind: input, shape index: {}]   ;;  %s2478_s4 = inlined_call_operand.vmem [shape: f32[128,1], index: 4, kind: input, shape index: {}]   ;;  %s2479_s5 = inlined_call_operand.vmem [shape: f32[128,1], index: 5, kind: input, shape index: {}]   ;;  %s2480_s6 = inlined_call_operand.hbm [shape: f32[128,512], index: 6, kind: input, shape index: {}]   ;;  %s2481_s7 = inlined_call_operand.hbm [shape: f32[2,128,512], index: 7, kind: output, shape index: {}]  }
   0x1   :  { %2492 = sst [smem:[#allocation25_spill]] %s2480_s6  ;;  %s12_s26 = sshll.u32 %s2474_s0, 4  ;;  %s13_s26 = int_to_ptr.vmem [resolvable:$true] %s12_s26 }
   0x2   :  { %s1505_s27 = scalar_lea.vmem %s13_s26, 128  ;;  %p1510_p1 = scmp.lt.s32.totalorder %s13_s26, %s13_s26 }
   0x3   :  { %p1506_p0 = scmp.ne.s32.totalorder %s13_s26, %s1505_s27  ;;  %p1511_p2 = scmp.lt.s32.totalorder %s1505_s27, %s1505_s27 }
   0x5   :  { %p1512_p3 = por %p1511_p2, %p1510_p1 }
   0x7   :  { %p1513_p4 = pnand %p1512_p3, %p1506_p0 }
   0x9   :  { %1516 = shalt.err (!%p1513_p4)  }
   0xa   :  { %s1691_s28 = smov [#allocation5]  }
   0xb   :  { %15 = dma.vmem_to_smem %s13_s26, 128, %s1691_s28, [#allocation4] }
   0xc   :  { %1627 = dma.done.wait [#allocation4], 128 }
   0xd   :  { %1628 = vsyncadd [#allocation4], 4294967168 }
   0xe   :  { %17 = sfence }
   0xf   :  { %18 = vsyncpa [#allocation7], 0 }
  0x10   :  { %20 = vsyncpa [#allocation7 + $0x1], 0 }
  0x11   :  { %21 = vsyncpa [#allocation8], 0 }
  0x12   :  { %23 = vsyncpa [#allocation8 + $0x1], 0  ;;  %s1744_s29 = smov 0   ;;  %s1746_s0 = smov 0  }
  0x13   :  { %s1748_s30 = smov 0   ;;  %s1750_s8 = smov 0  }
  0x14   :  { %s1752_s9 = smov 0   ;;  %s1754_s10 = smov 0  }
  0x15   :  { %s1756_s11 = smov 0   ;;  %s1758_s12 = smov 0  }
  0x16   :  { %s1760_s13 = smov 0   ;;  %s1762_s14 = smov 0  }
  0x17   :  { %s1764_s15 = smov 0  }
  0x18 LB: > { %2493 = sst [smem:[#allocation15_spill]] %s1649_s30  ;;  %s1240_s16 = sadd.s32 4294967295, %s1681_s15   ;;  %s1681_s15 = sphi %s1764_s15, %s29_s15   ;;  %s1677_s14 = sphi %s1762_s14, %s2521_s14   ;;  %s1673_s13 = sphi %s1760_s13, %s2520_s13   ;;  %s1669_s12 = sphi %s1758_s12, %s2519_s12   ;;  %s1665_s11 = sphi %s1756_s11, %s2518_s11   ;;  %s1661_s10 = sphi %s1754_s10, %s2524_s10   ;;  %s1657_s9 = sphi %s1752_s9, %s2516_s9   ;;  %s1653_s8 = sphi %s1750_s8, %s2515_s8   ;;  %s1649_s30 = sphi %s1748_s30, %s2514_s30   ;;  %s1645_s0 = sphi %s1746_s0, %s2523_s0   ;;  %s1641_s29 = sphi %s1744_s29, %s2522_s29  }
  0x19   : > { %2494 = sst [smem:[#allocation16_spill]] %s1657_s9  ;;  %s1241_s17 = sadd.s32 4294967294, %s1681_s15  }
  0x1a   : > { %2495 = sst [smem:[#allocation17_spill]] %s1661_s10  ;;  %s38_s18 = sadd.s32 1, %s1673_s13 }
  0x1b   : > { %2496 = sst [smem:[#allocation18_spill]] %s1673_s13  ;;  %s41_s19 = sadd.s32 1, %s1677_s14 }
  0x1c   : > { %2497 = sst [smem:[#allocation19_spill]] %s1677_s14  ;;  %p39_p5 = scmp.ge.s32.totalorder %s38_s18, 2 }
  0x1d   : > { %s139_s20 = sadd.s32 1, %s1661_s10  ;;  %p146_p6 = scmp.ne.s32.totalorder %s1661_s10, %s1657_s9 }
  0x1e   : > { %p147_p7 = scmp.eq.s32.totalorder %s1681_s15, 0  ;;  %s2526_s18 = smov (%p39_p5, %s38_s18), 0 }
  0x1f   : > { %2498 = sst [smem:[#allocation20_spill]] %s2526_s18  ;;  %s2528_s19 = smov (!%p39_p5, %s41_s19), %s1677_s14 }
  0x20   : > { %p1808_p8 = por %p147_p7, %p146_p6  ;;  %p152_p9 = scmp.ne.s32.totalorder %s1657_s9, %s1653_s8 }
  0x21   : > { %p43_p10 = scmp.ge.s32.totalorder %s2528_s19, 2  ;;  %p153_p11 = scmp.eq.s32.totalorder %s1240_s16, 0 }
  0x22   : > { %s162_s22 = ssub.s32 %s1673_s13, %s2526_s18  ;;  %s167_s23 = sadd.s32 1, %s1649_s30 }
  0x23   : > { %s2530_s19 = smov (%p43_p10, %s2528_s19), 0  ;;  %p1818_p12 = por %p153_p11, %p152_p9 }
  0x24   : > { %2500 = sst [smem:[#allocation21_spill]] %s2530_s19  ;;  %p177_p13 = scmp.ne.s32.totalorder %s1649_s30, %s1645_s0 }
  0x25   : > { %s136_s25 = ssub.s32 %s1677_s14, %s2530_s19  ;;  %p178_p0 = scmp.eq.s32.totalorder %s1240_s16, 3 }
  0x26   : > { %p137_p1 = scmp.eq.s32.totalorder %s136_s25, 0  ;;  %s164_s26 = sor.u32 %s162_s22, %s136_s25 }
  0x27   : > { %p165_p2 = scmp.eq.s32.totalorder %s164_s26, 0  ;;  %p1826_p3 = por %p178_p0, %p177_p13 }
  0x28   : > { %s1831_s28 = scalar_select %p137_p1, %s1661_s10, %s139_s20  }
  0x29   : > { %s2502_s27 = scalar_select %p1826_p3, 1, 0 }
  0x2a   : > { %2503 = sst [smem:[#allocation22_spill]] %s1831_s28  ;;  %p183_p4 = scmp.ne.s32.totalorder %s1645_s0, %s1641_s29 }
  0x2b   : > { %s1834_s8 = scalar_select %p165_p2, %s1649_s30, %s167_s23  }
  0x2c   : > { %p184_p5 = scmp.eq.s32.totalorder %s1241_s17, 3  ;;  %p1387_p6 = scmp.lt.s32.totalorder %s1681_s15, 4 }
  0x2d   : > { %2504 = sst [smem:[#allocation23_spill]] %s1834_s8  ;;  %s226_s16 = sand.u32 1, %s1661_s10  }
  0x2e   : > { %p1839_p7 = por %p184_p5, %p183_p4  ;;  %s1244_s19 = sshll.u32 %s226_s16, 8 }
  0x2f   : > { %s1262_s22 = sshll.u32 %s1677_s14, 8  ;;  %s2507_s6 = sld [smem:[#allocation25_spill]] }
  0x30   : > { %s2505_s18 = scalar_select %p1839_p7, 1, 0 }
  0x31   : > { %s230_s20 = scalar_lea.vmem [#allocation6], %s1244_s19  ;;  %p1854_p9 = pnand %p1387_p6, %p1808_p8 }
  0x32   : > { %2506 = sst [smem:[#allocation24_spill]] %s2505_s18  ;;  %s237_s23 = sshll.u32 %s230_s20, 4  ;;  %s1850_s23 = int_to_ptr.vmem [resolvable:$true] %s237_s23 }
  0x33   : > { %s1858_s14 = scalar_lea.sflag [#allocation7], %s226_s16  ;;  %p1519_p11 = pneg %p1854_p9 }
  0x35   : > { %s1848_s13 = scalar_lea.hbm %s2507_s6, %s1262_s22  ;;  %s1522_s21 = scalar_lea.hbm %s2507_s6, 8192 }
  0x36   : > { %s1517_s25 = scalar_lea.hbm %s1848_s13, 4096  ;;  %p1523_p8 = scmp.lt.u32.totalorder %s1848_s13, %s2507_s6 }
  0x37   : > { %p1518_p10 = scmp.ne.s32.totalorder %s1848_s13, %s1517_s25  ;;  %p1524_p1 = scmp.lt.u32.totalorder %s1522_s21, %s1517_s25 }
  0x38   : > { %p1526_p4 = scmp.lt.u32.totalorder %s1517_s25, %s1848_s13 }
  0x39   : > { %p1520_p13 = pnand %p1519_p11, %p1518_p10  ;;  %p1525_p2 = por %p1524_p1, %p1523_p8 }
  0x3b   : > { %p1521_p0 = pneg %p1520_p13  ;;  %p1527_p5 = por %p1526_p4, %p1525_p2 }
  0x3d   : > { %p1528_p6 = pnand %p1527_p5, %p1521_p0 }
  0x3f   : > { %1531 = shalt.err (!%p1528_p6)
}
  0x40   : > { %s1532_s16 = scalar_lea.vmem %s1850_s23, 4096  ;;  %s1692_s19 = smov [#allocation6]  }
  0x41   : > { %p1533_p10 = scmp.ne.s32.totalorder %s1850_s23, %s1532_s16  ;;  %s1537_s22 = sshll.u32 %s1692_s19, 4  ;;  %s1538_s22 = int_to_ptr.vmem [resolvable:$false] %s1537_s22 }
  0x42   : > { %s1539_s26 = scalar_lea.vmem %s1538_s22, 8192  ;;  %p1540_p3 = scmp.lt.s32.totalorder %s1850_s23, %s1538_s22 }
  0x43   : > { %p1535_p13 = pnand %p1533_p10, %p1519_p11  ;;  %p1541_p8 = scmp.lt.s32.totalorder %s1539_s26, %s1532_s16 }
  0x45   : > { %p1536_p7 = pneg %p1535_p13  ;;  %p1542_p1 = por %p1541_p8, %p1540_p3 }
  0x47   : > { %p1543_p2 = pnand %p1542_p1, %p1536_p7 }
  0x49   : > { %1546 = shalt.err (!%p1543_p2)
}
  0x4a   : > { %s1693_s25 = smov 512   ;;  %s1694_s21 = smov 256  }
  0x4b   : > { %s1695_s20 = smov 16   ;;  %p1247_p11 = scmp.ge.s32.totalorder %s1681_s15, 1 }
  0x4c   : > { %1382 = dma.hbm_to_vmem [thread:$0]  (!%p1854_p9), %s1848_s13, 4096, %s1850_s23, %s1858_s14, %s1693_s25, %s1694_s21, %s1695_s20  }
  0x4d   : > { %p245_p0 = scmp.lt.s32.totalorder %s1681_s15, 5 }
  0x4f   : > { %p246_p4 = pnand %p1247_p11, %p245_p0 }
  0x50   : > { %s251_s16 = sand.u32 (!%p246_p4), 1, %s1657_s9  }
  0x51   : > { %249 = sbr.rel (%p246_p4) target bundleno = 638 (0x27e), region = 40  ;;  %s1248_s19 = sshll.u32 (!%p246_p4), %s251_s16, 8 }
  0x52   : > { %s252_s22 = scalar_lea.sflag (!%p246_p4), [#allocation7], %s251_s16  ;;  %s1889_s26 = scalar_lea.vmem (!%p246_p4), [#allocation6], %s1248_s19 }
  0x58   : > { %1630 = dma.done.wait (%p1818_p12), %s252_s22, 4096  }
  0x59   : > { %1632 = vsyncadd (%p1818_p12), %s252_s22, 4294963200  ;;  %s2489_s13 = sand.u32 1, %s1645_s0   ;;  %s1897_s14 = sshll.u32 %s1669_s12, 1 }
  0x5a   : > { %s1249_s23 = sshll.u32 %s2489_s13, 8  ;;  %p292_p3 = scmp.lt.s32.totalorder %s1665_s11, 1 }
  0x5b   : > { %p294_p7 = scmp.lt.s32.totalorder %s1897_s14, 3  ;;  %s1253_s21 = sshll.u32 %s1665_s11, 9 }
  0x5c   : > { %s293_s17 = scalar_select %p292_p3, %s1665_s11, 1 }
  0x5d   : > { %s295_s25 = scalar_select %p294_p7, %s1897_s14, 3 }
  0x5e   : > { %s1251_s24 = sshll.u32 %s293_s17, 2  ;;  %s1254_s16 = sshll.u32 %s1669_s12, 8 }
  0x5f   : > { %s297_s20 = sadd.s32 %s1251_s24, %s295_s25  ;;  %s305_s22 = sadd.s32 %s1254_s16, %s1253_s21 }
  0x60   : > { %s1252_s19 = sshll.u32 %s297_s20, 2  ;;  %s1912_s9 = scalar_lea.vmem [#allocation9], %s1249_s23 }
  0x61   : > { %s1910_s10 = scalar_lea.vmem %s2476_s2, %s1252_s19  ;;  %s1683_s8 = smov 0  }
  0x62 LB: >> { %s312_s13 = sadd.s32 %s1685_s8, %s305_s22  ;;  %s314_s17 = smul.u32 24, %s1665_s11  ;;  %s1685_s8 = sphi %s1683_s8, %s311_s8  }
  0x63   : >> { %s313_s30 = sld [smem:[#allocation5 + %s312_s13]]  ;;  %s317_s21 = scalar_lea.vmem [#allocation2], %s1685_s8 }
  0x69   : >> { %s315_s18 = sadd.s32 %s314_s17, %s313_s30 }
  0x6a   : >> { %s316_s24 = scalar_lea.vmem %s2475_s1, %s315_s18 }
  0x6b   : >> { %v335_v0 = vld [vmem:[%s316_s24] sm:$0x1] }
  0x6c   : >> { %336 = vst [vmem:[%s317_s21] sm:$0x1] %v335_v0 }
  0x6d   : >> { %361 = vsyncadd [#allocation3], 16  ;;  %s311_s8 = sadd.s32 1, %s1685_s8  }
  0x6e   : >> { %p308_p12 = scmp.ge.s32.totalorder %s311_s8, 256  }
  0x6f   : > { %v365_v1 = vld [vmem:[%s2478_s4 + $0x10] sm:$0xff] (%p308_p12)  ;;  %v363_v2 = vld [vmem:[%s2478_s4] sm:$0xff] (%p308_p12)  ;;  %v1696_v3 = vmov (%p308_p12), 0   ;;  %v366_v4 = vld [vmem:[%s2478_s4 + $0x18] sm:$0xff] (%p308_p12)  ;;  %v464_v43 = vlaneseq (%p308_p12) }
  0x70   : > { %310 = sbr.rel (!%p308_p12) target bundleno = 98 (0x62), region = 144  ;;  %1502 = vset.pattern.permute.xlu1 (%p308_p12), %v1696_v3  ;;  %1501 = vset.pattern.permute.xlu0 (%p308_p12), %v1696_v3  ;;  %v364_v5 = vld [vmem:[%s2478_s4 + $0x8] sm:$0xff] (%p308_p12)  ;;  %v367_v7 = vld [vmem:[%s2478_s4 + $0x20] sm:$0xff] (%p308_p12)  ;;  %v370_v8 = vld [vmem:[%s2478_s4 + $0x38] sm:$0xff] (%p308_p12) }
  0x71   : > { %395 = vperm.xlu1 (%p308_p12), %1502, %v365_v1   ;;  %385 = vperm.xlu0 (%p308_p12), %1501, %v363_v2   ;;  %v368_v6 = vld [vmem:[%s2478_s4 + $0x28] sm:$0xff] (%p308_p12)  ;;  %v369_v9 = vld [vmem:[%s2478_s4 + $0x30] sm:$0xff] (%p308_p12)  ;;  %v371_v11 = vld [vmem:[%s2478_s4 + $0x40] sm:$0xff] (%p308_p12)  ;;  %v2024_v46 = vshrl.u32 (%p308_p12), %v464_v43, 7 }
  0x72   : > { %v372_v10 = vld [vmem:[%s2478_s4 + $0x48] sm:$0xff] (%p308_p12)  ;;  %v374_v12 = vld [vmem:[%s2478_s4 + $0x58] sm:$0xff] (%p308_p12)  ;;  %v373_v13 = vld [vmem:[%s2478_s4 + $0x50] sm:$0xff] (%p308_p12) }
  0x73   : > { %v376_v14 = vld [vmem:[%s2478_s4 + $0x68] sm:$0xff] (%p308_p12)  ;;  %v375_v15 = vld [vmem:[%s2478_s4 + $0x60] sm:$0xff] (%p308_p12)  ;;  %v378_v16 = vld [vmem:[%s2478_s4 + $0x78] sm:$0xff] (%p308_p12)  ;;  %v466_v50 = vsub.s32 (%p308_p12), 0, %v2024_v46  ;;  %v470_v51 = vsub.s32 (%p308_p12), 4, %v2024_v46  ;;  %v613_v55 = vsub.s32 (%p308_p12), 1, %v2024_v46 }
  0x74   : > { %v377_v17 = vld [vmem:[%s2478_s4 + $0x70] sm:$0xff] (%p308_p12)  ;;  %v515_v18 = vld [vmem:[%s2479_s5 + $0x8] sm:$0xff] (%p308_p12)  ;;  %v514_v19 = vld [vmem:[%s2479_s5] sm:$0xff] (%p308_p12)  ;;  %v617_v56 = vsub.s32 (%p308_p12), 5, %v2024_v46 }
  0x75   : > { %400 = vperm.xlu1 (%p308_p12), %1502, %v366_v4   ;;  %390 = vperm.xlu0 (%p308_p12), %1501, %v364_v5   ;;  %v517_v20 = vld [vmem:[%s2479_s5 + $0x18] sm:$0xff] (%p308_p12)  ;;  %v516_v21 = vld [vmem:[%s2479_s5 + $0x10] sm:$0xff] (%p308_p12)  ;;  %v519_v22 = vld [vmem:[%s2479_s5 + $0x28] sm:$0xff] (%p308_p12) }
  0x76   : > { %v518_v23 = vld [vmem:[%s2479_s5 + $0x20] sm:$0xff] (%p308_p12)  ;;  %v521_v24 = vld [vmem:[%s2479_s5 + $0x38] sm:$0xff] (%p308_p12)  ;;  %v520_v25 = vld [vmem:[%s2479_s5 + $0x30] sm:$0xff] (%p308_p12) }
  0x77   : > { %v523_v26 = vld [vmem:[%s2479_s5 + $0x48] sm:$0xff]  ;;  %v522_v27 = vld [vmem:[%s2479_s5 + $0x40] sm:$0xff]  ;;  %v525_v28 = vld [vmem:[%s2479_s5 + $0x58] sm:$0xff] }
  0x78   : > { %v524_v29 = vld [vmem:[%s2479_s5 + $0x50] sm:$0xff]  ;;  %v527_v30 = vld [vmem:[%s2479_s5 + $0x68] sm:$0xff]  ;;  %v526_v31 = vld [vmem:[%s2479_s5 + $0x60] sm:$0xff] }
  0x79   : > { %410 = vperm.xlu1 %1502, %v368_v6   ;;  %405 = vperm.xlu0 %1501, %v367_v7   ;;  %v529_v32 = vld [vmem:[%s2479_s5 + $0x78] sm:$0xff]  ;;  %v528_v33 = vld [vmem:[%s2479_s5 + $0x70] sm:$0xff]  ;;  %v2015_v34 = vld [vmem:[%s1910_s10] sm:$0x77]  ;;  %s1687_s10 = smov 0  }
  0x7a   : > { %v379_v35 = vmul.f32 0.0014285714, %v2015_v34  ;;  %v614_v61 = vrot.slane %v2015_v34, %v613_v55  ;;  %v618_v62 = vrot.slane %v2015_v34, %v617_v56 }
  0x7c   : > { %v380_v38 = vadd.f32 1.0, %v379_v35  ;;  %v2052_v3 = vrot.slane %v614_v61, %v613_v55  ;;  %v2054_v4 = vrot.slane %v618_v62, %v613_v55 }
  0x7d   : > { %420 = vperm.xlu1 %1502, %v370_v8   ;;  %415 = vperm.xlu0 %1501, %v369_v9  }
  0x7e   : > { %1503 = vlog2.f32 %v380_v38 }
  0x81   : > { %430 = vperm.xlu1 %1502, %v372_v10   ;;  %425 = vperm.xlu0 %1501, %v371_v11   ;;  %v695_v11 = vld [vmem:[%s1889_s26 + $0x10] sm:$0xff] }
  0x85   : > { %440 = vperm.xlu1 %1502, %v374_v12   ;;  %435 = vperm.xlu0 %1501, %v373_v13  }
  0x88   : > { %v1504_v49 = vpop.eup %1503 }
  0x89   : > { %450 = vperm.xlu1 %1502, %v376_v14   ;;  %445 = vperm.xlu0 %1501, %v375_v15   ;;  %v382_v52 = vmul.f32 0.6931472, %v1504_v49 }
  0x8b   : > { %v467_v57 = vrot.slane %v382_v52, %v466_v50  ;;  %v471_v58 = vrot.slane %v382_v52, %v470_v51  ;;  %v697_v51 = vld [vmem:[%s1889_s26 + $0x20] sm:$0xff]  ;;  %v698_v52 = vld [vmem:[%s1889_s26 + $0x28] sm:$0xff] }
  0x8d   : > { %460 = vperm.xlu1 %1502, %v378_v16   ;;  %455 = vperm.xlu0 %1501, %v377_v17   ;;  %v2044_v63 = vrot.slane %v467_v57, %v466_v50  ;;  %v2046_v0 = vrot.slane %v471_v58, %v466_v50  ;;  %v696_v16 = vld [vmem:[%s1889_s26 + $0x18] sm:$0xff]  ;;  %v693_v17 = vld [vmem:[%s1889_s26] sm:$0xff] }
  0x8e   : > { %v700_v50 = vld [vmem:[%s1889_s26 + $0x38] sm:$0xff] }
  0x91   : > { %537 = vperm.xlu1 %1502, %v515_v18   ;;  %532 = vperm.xlu0 %1501, %v514_v19   ;;  %v694_v18 = vld [vmem:[%s1889_s26 + $0x8] sm:$0xff] }
  0x95   : > { %547 = vperm.xlu1 %1502, %v517_v20   ;;  %542 = vperm.xlu0 %1501, %v516_v21  }
  0x99   : > { %557 = vperm.xlu1 %1502, %v519_v22   ;;  %552 = vperm.xlu0 %1501, %v518_v23  }
  0x9d   : > { %567 = vperm.xlu1 %1502, %v521_v24   ;;  %562 = vperm.xlu0 %1501, %v520_v25  }
  0xa1   : > { %577 = vperm.xlu1 %1502, %v523_v26   ;;  %572 = vperm.xlu0 %1501, %v522_v27  }
  0xa5   : > { %587 = vperm.xlu1 %1502, %v525_v28   ;;  %582 = vperm.xlu0 %1501, %v524_v29  }
  0xa9   : > { %597 = vperm.xlu1 %1502, %v527_v30   ;;  %592 = vperm.xlu0 %1501, %v526_v31  }
  0xad   : > { %607 = vperm.xlu1 %1502, %v529_v32   ;;  %602 = vperm.xlu0 %1501, %v528_v33   ;;  %v699_v33 = vld [vmem:[%s1889_s26 + $0x30] sm:$0xff] }
  0xf0   : > { %v396_v36 = vpop.permute.xlu1 %395  ;;  %v386_v37 = vpop.permute.xlu0 %385 }
  0xf1   : > { %v482_v5 = vmul.f32 %v2044_v63, %v386_v37  ;;  %v483_v6 = vmul.f32 %v2046_v0, %v386_v37  ;;  %v486_v23 = vmul.f32 %v2044_v63, %v396_v36  ;;  %v487_v24 = vmul.f32 %v2046_v0, %v396_v36 }
  0xf4   : > { %v401_v39 = vpop.permute.xlu1 %400  ;;  %v391_v40 = vpop.permute.xlu0 %390 }
  0xf5   : > { %v484_v7 = vmul.f32 %v2044_v63, %v391_v40  ;;  %v485_v8 = vmul.f32 %v2046_v0, %v391_v40  ;;  %v488_v25 = vmul.f32 %v2044_v63, %v401_v39  ;;  %v489_v26 = vmul.f32 %v2046_v0, %v401_v39 }
  0xf8   : > { %v411_v41 = vpop.permute.xlu1 %410  ;;  %v2018_v42 = vpop.permute.xlu0 %405 }
  0xf9   : > { %v492_v39 = vmul.f32 %v2044_v63, %v411_v41  ;;  %v493_v40 = vmul.f32 %v2046_v0, %v411_v41  ;;  %v490_v43 = vmul.f32 %v2044_v63, %v2018_v42  ;;  %v491_v49 = vmul.f32 %v2046_v0, %v2018_v42 }
  0xfc   : > { %v2020_v44 = vpop.permute.xlu1 %420  ;;  %v2022_v45 = vpop.permute.xlu0 %415 }
 0x100   : > { %v2026_v47 = vpop.permute.xlu1 %430  ;;  %v2028_v48 = vpop.permute.xlu0 %425 }
 0x104   : > { %v2032_v53 = vpop.permute.xlu1 %440  ;;  %v2034_v54 = vpop.permute.xlu0 %435 }
 0x108   : > { %v2038_v59 = vpop.permute.xlu1 %450  ;;  %v2040_v60 = vpop.permute.xlu0 %445 }
 0x10c   : > { %v2048_v1 = vpop.permute.xlu1 %460  ;;  %v2050_v2 = vpop.permute.xlu0 %455 }
 0x110   : > { %v538_v9 = vpop.permute.xlu1 %537  ;;  %v533_v10 = vpop.permute.xlu0 %532 }
 0x111   : > { %v631_v12 = vmul.f32 %v2052_v3, %v538_v9  ;;  %v632_v13 = vmul.f32 %v2054_v4, %v538_v9  ;;  %v629_v14 = vmul.f32 %v2052_v3, %v533_v10  ;;  %v630_v15 = vmul.f32 %v2054_v4, %v533_v10 }
 0x113   : > { %v663_v19 = vadd.f32 %v631_v12, %v484_v7  ;;  %v664_v20 = vadd.f32 %v632_v13, %v485_v8  ;;  %v661_v21 = vadd.f32 %v629_v14, %v482_v5  ;;  %v662_v22 = vadd.f32 %v630_v15, %v483_v6  ;;  %v703_v5 = vld [vmem:[%s1889_s26 + $0x50] sm:$0xff]  ;;  %v704_v12 = vld [vmem:[%s1889_s26 + $0x58] sm:$0xff]  ;;  %v701_v13 = vld [vmem:[%s1889_s26 + $0x40] sm:$0xff] }
 0x114   : > { %v548_v27 = vpop.permute.xlu1 %547  ;;  %v543_v28 = vpop.permute.xlu0 %542  ;;  %v702_v14 = vld [vmem:[%s1889_s26 + $0x48] sm:$0xff] }
 0x115   : > { %v2072_v29 = vadd.f32 %v695_v11, %v663_v19  ;;  %v2074_v30 = vadd.f32 %v696_v16, %v664_v20  ;;  %v2076_v31 = vadd.f32 %v693_v17, %v661_v21  ;;  %v2078_v32 = vadd.f32 %v694_v18, %v662_v22 }
 0x116   : > { %v635_v35 = vmul.f32 %v2052_v3, %v548_v27  ;;  %v636_v36 = vmul.f32 %v2054_v4, %v548_v27  ;;  %v633_v37 = vmul.f32 %v2052_v3, %v543_v28  ;;  %v634_v38 = vmul.f32 %v2054_v4, %v543_v28 }
 0x117   : > { %v496_v19 = vmul.f32 %v2044_v63, %v2020_v44  ;;  %v497_v20 = vmul.f32 %v2046_v0, %v2020_v44  ;;  %v494_v21 = vmul.f32 %v2044_v63, %v2022_v45  ;;  %v495_v22 = vmul.f32 %v2046_v0, %v2022_v45  ;;  %v707_v44 = vld [vmem:[%s1889_s26 + $0x70] sm:$0xff] }
 0x118   : > { %v667_v55 = vadd.f32 %v635_v35, %v488_v25  ;;  %v668_v56 = vadd.f32 %v636_v36, %v489_v26  ;;  %v665_v57 = vadd.f32 %v633_v37, %v486_v23  ;;  %v666_v58 = vadd.f32 %v634_v38, %v487_v24  ;;  %v558_v61 = vpop.permute.xlu1 %557  ;;  %v553_v62 = vpop.permute.xlu0 %552 }
 0x119   : > { %v639_v41 = vmul.f32 %v2052_v3, %v558_v61  ;;  %v640_v6 = vmul.f32 %v2054_v4, %v558_v61  ;;  %v637_v7 = vmul.f32 %v2052_v3, %v553_v62  ;;  %v638_v42 = vmul.f32 %v2054_v4, %v553_v62  ;;  %v711_v61 = vld [vmem:[%s1889_s26 + $0x90] sm:$0xff] }
 0x11a   : > { %v2099_v8 = vadd.f32 %v699_v33, %v667_v55  ;;  %v2101_v9 = vadd.f32 %v700_v50, %v668_v56  ;;  %v2103_v10 = vadd.f32 %v697_v51, %v665_v57  ;;  %v2105_v11 = vadd.f32 %v698_v52, %v666_v58  ;;  %v706_v50 = vld [vmem:[%s1889_s26 + $0x68] sm:$0xff] }
 0x11b   : > { %v671_v15 = vadd.f32 %v639_v41, %v492_v39  ;;  %v672_v16 = vadd.f32 %v640_v6, %v493_v40  ;;  %v669_v17 = vadd.f32 %v637_v7, %v490_v43  ;;  %v670_v18 = vadd.f32 %v638_v42, %v491_v49  ;;  %v708_v43 = vld [vmem:[%s1889_s26 + $0x78] sm:$0xff]  ;;  %v705_v49 = vld [vmem:[%s1889_s26 + $0x60] sm:$0xff] }
 0x11c   : > { %v568_v23 = vpop.permute.xlu1 %567  ;;  %v563_v24 = vpop.permute.xlu0 %562  ;;  %v500_v37 = vmul.f32 %v2044_v63, %v2026_v47  ;;  %v501_v38 = vmul.f32 %v2046_v0, %v2026_v47  ;;  %v498_v39 = vmul.f32 %v2044_v63, %v2028_v48  ;;  %v499_v40 = vmul.f32 %v2046_v0, %v2028_v48 }
 0x11d   : > { %v2118_v25 = vadd.f32 %v703_v5, %v671_v15  ;;  %v2120_v26 = vadd.f32 %v704_v12, %v672_v16  ;;  %v2122_v27 = vadd.f32 %v701_v13, %v669_v17  ;;  %v2124_v28 = vadd.f32 %v702_v14, %v670_v18  ;;  %v712_v12 = vld [vmem:[%s1889_s26 + $0x98] sm:$0xff]  ;;  %v709_v13 = vld [vmem:[%s1889_s26 + $0x80] sm:$0xff]  ;;  %v710_v14 = vld [vmem:[%s1889_s26 + $0x88] sm:$0xff] }
 0x11e   : > { %v643_v33 = vmul.f32 %v2052_v3, %v568_v23  ;;  %v644_v35 = vmul.f32 %v2054_v4, %v568_v23  ;;  %v641_v45 = vmul.f32 %v2052_v3, %v563_v24  ;;  %v642_v36 = vmul.f32 %v2054_v4, %v563_v24 }
 0x120   : > { %v675_v51 = vadd.f32 %v643_v33, %v496_v19  ;;  %v676_v52 = vadd.f32 %v644_v35, %v497_v20  ;;  %v673_v55 = vadd.f32 %v641_v45, %v494_v21  ;;  %v674_v56 = vadd.f32 %v642_v36, %v495_v22  ;;  %v578_v57 = vpop.permute.xlu1 %577  ;;  %v573_v58 = vpop.permute.xlu0 %572 }
 0x121   : > { %v647_v47 = vmul.f32 %v2052_v3, %v578_v57  ;;  %v648_v62 = vmul.f32 %v2054_v4, %v578_v57  ;;  %v645_v5 = vmul.f32 %v2052_v3, %v573_v58  ;;  %v646_v48 = vmul.f32 %v2054_v4, %v573_v58 }
 0x122   : > { %v2147_v41 = vadd.f32 %v707_v44, %v675_v51  ;;  %v2149_v6 = vadd.f32 %v708_v43, %v676_v52  ;;  %v2151_v7 = vadd.f32 %v705_v49, %v673_v55  ;;  %v2153_v42 = vadd.f32 %v706_v50, %v674_v56  ;;  %v716_v50 = vld [vmem:[%s1889_s26 + $0xb8] sm:$0xff]  ;;  %v713_v51 = vld [vmem:[%s1889_s26 + $0xa0] sm:$0xff]  ;;  %v714_v52 = vld [vmem:[%s1889_s26 + $0xa8] sm:$0xff] }
 0x123   : > { %v679_v15 = vadd.f32 %v647_v47, %v500_v37  ;;  %v680_v16 = vadd.f32 %v648_v62, %v501_v38  ;;  %v677_v17 = vadd.f32 %v645_v5, %v498_v39  ;;  %v678_v18 = vadd.f32 %v646_v48, %v499_v40  ;;  %v719_v62 = vld [vmem:[%s1889_s26 + $0xd0] sm:$0xff] }
 0x124   : > { %v504_v19 = vmul.f32 %v2044_v63, %v2032_v53  ;;  %v505_v20 = vmul.f32 %v2046_v0, %v2032_v53  ;;  %v502_v21 = vmul.f32 %v2044_v63, %v2034_v54  ;;  %v503_v22 = vmul.f32 %v2046_v0, %v2034_v54  ;;  %v588_v23 = vpop.permute.xlu1 %587  ;;  %v583_v24 = vpop.permute.xlu0 %582  ;;  %v715_v53 = vld [vmem:[%s1889_s26 + $0xb0] sm:$0xff] }
 0x125   : > { %v2166_v44 = vadd.f32 %v711_v61, %v679_v15  ;;  %v2168_v33 = vadd.f32 %v712_v12, %v680_v16  ;;  %v2170_v35 = vadd.f32 %v709_v13, %v677_v17  ;;  %v2172_v45 = vadd.f32 %v710_v14, %v678_v18  ;;  %v720_v16 = vld [vmem:[%s1889_s26 + $0xd8] sm:$0xff]  ;;  %v717_v17 = vld [vmem:[%s1889_s26 + $0xc0] sm:$0xff]  ;;  %v718_v18 = vld [vmem:[%s1889_s26 + $0xc8] sm:$0xff] }
 0x126   : > { %v651_v36 = vmul.f32 %v2052_v3, %v588_v23  ;;  %v652_v37 = vmul.f32 %v2054_v4, %v588_v23  ;;  %v649_v54 = vmul.f32 %v2052_v3, %v583_v24  ;;  %v650_v38 = vmul.f32 %v2054_v4, %v583_v24 }
 0x127   : > { %v508_v39 = vmul.f32 %v2044_v63, %v2038_v59  ;;  %v509_v40 = vmul.f32 %v2046_v0, %v2038_v59  ;;  %v506_v43 = vmul.f32 %v2044_v63, %v2040_v60  ;;  %v507_v49 = vmul.f32 %v2046_v0, %v2040_v60 }
 0x128   : > { %v683_v55 = vadd.f32 %v651_v36, %v504_v19  ;;  %v684_v56 = vadd.f32 %v652_v37, %v505_v20  ;;  %v681_v57 = vadd.f32 %v649_v54, %v502_v21  ;;  %v682_v58 = vadd.f32 %v650_v38, %v503_v22  ;;  %v598_v61 = vpop.permute.xlu1 %597  ;;  %v593_v47 = vpop.permute.xlu0 %592 }
 0x129   : > { %v655_v59 = vmul.f32 %v2052_v3, %v598_v61  ;;  %v656_v5 = vmul.f32 %v2054_v4, %v598_v61  ;;  %v653_v48 = vmul.f32 %v2052_v3, %v593_v47  ;;  %v654_v60 = vmul.f32 %v2054_v4, %v593_v47 }
 0x12a   : > { %v2195_v12 = vadd.f32 %v715_v53, %v683_v55  ;;  %v2197_v13 = vadd.f32 %v716_v50, %v684_v56  ;;  %v2199_v14 = vadd.f32 %v713_v51, %v681_v57  ;;  %v2201_v15 = vadd.f32 %v714_v52, %v682_v58  ;;  %v722_v52 = vld [vmem:[%s1889_s26 + $0xe8] sm:$0xff] }
 0x12b   : > { %v687_v19 = vadd.f32 %v655_v59, %v508_v39  ;;  %v688_v20 = vadd.f32 %v656_v5, %v509_v40  ;;  %v685_v21 = vadd.f32 %v653_v48, %v506_v43  ;;  %v686_v22 = vadd.f32 %v654_v60, %v507_v49  ;;  %v723_v49 = vld [vmem:[%s1889_s26 + $0xf0] sm:$0xff] }
 0x12c   : > { %v512_v23 = vmul.f32 %v2044_v63, %v2048_v1  ;;  %v513_v24 = vmul.f32 %v2046_v0, %v2048_v1  ;;  %v510_v53 = vmul.f32 %v2044_v63, %v2050_v2  ;;  %v511_v36 = vmul.f32 %v2046_v0, %v2050_v2  ;;  %v608_v37 = vpop.permute.xlu1 %607  ;;  %v603_v54 = vpop.permute.xlu0 %602  ;;  %v724_v0 = vld [vmem:[%s1889_s26 + $0xf8] sm:$0xff]  ;;  %v721_v2 = vld [vmem:[%s1889_s26 + $0xe0] sm:$0xff] }
 0x12d   : > { %v2214_v38 = vadd.f32 %v719_v62, %v687_v19  ;;  %v2216_v39 = vadd.f32 %v720_v16, %v688_v20  ;;  %v2218_v40 = vadd.f32 %v717_v17, %v685_v21  ;;  %v2220_v43 = vadd.f32 %v718_v18, %v686_v22 }
 0x12e   : > { %v659_v1 = vmul.f32 %v2052_v3, %v608_v37  ;;  %v660_v50 = vmul.f32 %v2054_v4, %v608_v37  ;;  %v657_v63 = vmul.f32 %v2052_v3, %v603_v54  ;;  %v658_v51 = vmul.f32 %v2054_v4, %v603_v54 }
 0x130   : > { %v691_v55 = vadd.f32 %v659_v1, %v512_v23  ;;  %v692_v56 = vadd.f32 %v660_v50, %v513_v24  ;;  %v689_v57 = vadd.f32 %v657_v63, %v510_v53  ;;  %v690_v58 = vadd.f32 %v658_v51, %v511_v36 }
 0x132   : > { %v2230_v61 = vadd.f32 %v723_v49, %v691_v55  ;;  %v2232_v47 = vadd.f32 %v724_v0, %v692_v56  ;;  %v2234_v62 = vadd.f32 %v721_v2, %v689_v57  ;;  %v2236_v59 = vadd.f32 %v722_v52, %v690_v58 }
 0x133 LB: >> { %1633 = dma.done.wait [#allocation3], 16  ;;  %s1689_s10 = sphi %s1687_s10, %s762_s10  }
 0x134   : >> { %1634 = vsyncadd [#allocation3], 4294967280  ;;  %s762_s10 = sadd.s32 1, %s1689_s10  }
 0x135   : >> { %p759_p9 = scmp.ge.s32.totalorder %s762_s10, 256  }
 0x136   : > { %v782_v3 = vld [vmem:[#allocation2 + $0x80] sm:$0xff] (%p759_p9)  ;;  %v783_v4 = vld [vmem:[#allocation2 + $0x88] sm:$0xff] (%p759_p9)  ;;  %v784_v16 = vld [vmem:[#allocation2 + $0x90] sm:$0xff] (%p759_p9)  ;;  %s1257_s12 = sshll.u32 (%p759_p9), %s1665_s11, 6  ;;  %s2509_s6 = sand.u32 (%p759_p9), 1, %s1645_s0  }
 0x137   : > { %761 = sbr.rel (!%p759_p9) target bundleno = 307 (0x133), region = 155  ;;  %v766_v5 = vld [vmem:[#allocation2] sm:$0xff] (%p759_p9)  ;;  %v1327_v48 = vpack.c.bf16 (%p759_p9), %v783_v4, %v782_v3  ;;  %v767_v60 = vld [vmem:[#allocation2 + $0x8] sm:$0xff] (%p759_p9)  ;;  %v785_v17 = vld [vmem:[#allocation2 + $0x98] sm:$0xff] (%p759_p9)  ;;  %s2372_s24 = sadd.s32 (%p759_p9), %s1257_s12, %s1897_s14 }
 0x138   : > { %v1329_v18 = vpack.c.bf16 (%p759_p9), %v767_v60, %v766_v5  ;;  %v1331_v19 = vpack.c.bf16 (%p759_p9), %v785_v17, %v784_v16  ;;  %v768_v20 = vld [vmem:[#allocation2 + $0x10] sm:$0xff] (%p759_p9)  ;;  %v769_v21 = vld [vmem:[#allocation2 + $0x18] sm:$0xff] (%p759_p9)  ;;  %v786_v22 = vld [vmem:[#allocation2 + $0xa0] sm:$0xff] (%p759_p9)  ;;  %s1258_s11 = sshll.u32 (%p759_p9), %s2372_s24, 7  ;;  %s1105_s14 = sshll.u32 (%p759_p9), %s1912_s9, 4  ;;  %s2403_s14 = int_to_ptr.vmem [resolvable:$true] %s1105_s14 }
 0x139   : > { %1328 = vmatprep.subr.bf16.mxu0 (%p759_p9), %v1327_v48  ;;  %1359 = vmatprep.subr.bf16.mxu1 (%p759_p9), %v1327_v48  ;;  %v787_v23 = vld [vmem:[#allocation2 + $0xa8] sm:$0xff] (%p759_p9)  ;;  %v1333_v24 = vpack.c.bf16 (%p759_p9), %v769_v21, %v768_v20  ;;  %v2241_v36 = vld [vmem:[%s2477_s3] sm:$0xff] (%p759_p9)  ;;  %v788_v1 = vld [vmem:[#allocation2 + $0xb0] sm:$0xff] (%p759_p9)  ;;  %s2399_s26 = scalar_lea.hbm (%p759_p9), %s2481_s7, %s1258_s11  ;;  %s2413_s28 = scalar_lea.sflag (%p759_p9), [#allocation8], %s2509_s6 }
 0x13a   : > { %1330 = vmatpush3.bf16.xpose.msra.mxu0 (%p759_p9), %v1329_v18  ;;  %1367 = vmatpush3.bf16.xpose.msra.mxu1 (%p759_p9), %v1329_v18  ;;  %v1335_v53 = vpack.c.bf16 (%p759_p9), %v787_v23, %v786_v22  ;;  %v2247_v37 = vld [vmem:[%s2477_s3 + $0x40] sm:$0xff] (%p759_p9)  ;;  %v771_v49 = vld [vmem:[#allocation2 + $0x28] sm:$0xff] (%p759_p9)  ;;  %v789_v50 = vld [vmem:[#allocation2 + $0xb8] sm:$0xff] (%p759_p9)  ;;  %s1547_s23 = scalar_lea.vmem (%p759_p9), %s2403_s14, 4096  ;;  %p2510_p6 = scmp.ne.s32.totalorder (%p759_p9), %s2502_s27, 0 }
 0x13b   : > { %1332 = vmatprep.subr.bf16.mxu0 (%p759_p9), %v1331_v19  ;;  %1360 = vmatprep.subr.bf16.mxu1 (%p759_p9), %v1331_v19  ;;  %v770_v54 = vld [vmem:[#allocation2 + $0x20] sm:$0xff] (%p759_p9)  ;;  %v1339_v51 = vpack.c.bf16 (%p759_p9), %v789_v50, %v788_v1  ;;  %v772_v0 = vld [vmem:[#allocation2 + $0x30] sm:$0xff] (%p759_p9)  ;;  %v773_v2 = vld [vmem:[#allocation2 + $0x38] sm:$0xff] (%p759_p9)  ;;  %p1548_p5 = scmp.ne.s32.totalorder (%p759_p9), %s2403_s14, %s1547_s23  ;;  %s1697_s13 = smov (%p759_p9), [#allocation9]  }
 0x13c   : > { %1295 = vmatprep.mubr.f32.mxu0 (%p759_p9), %v2241_v36  ;;  %1311 = vmatprep.mubr.f32.mxu1 (%p759_p9), %v2247_v37  ;;  %v1337_v63 = vpack.c.bf16 (%p759_p9), %v771_v49, %v770_v54  ;;  %v790_v52 = vld [vmem:[#allocation2 + $0xc0] sm:$0xff] (%p759_p9)  ;;  %v791_v55 = vld [vmem:[#allocation2 + $0xc8] sm:$0xff] (%p759_p9)  ;;  %v1341_v56 = vpack.c.bf16 (%p759_p9), %v773_v2, %v772_v0  ;;  %v792_v4 = vld [vmem:[#allocation2 + $0xd0] sm:$0xff] (%p759_p9)  ;;  %s1551_s30 = sshll.u32 (%p759_p9), %s1697_s13, 4  ;;  %s1552_s30 = int_to_ptr.vmem [resolvable:$false] %s1551_s30 }
 0x13d   : > { %v1343_v57 = vpack.c.bf16 (%p759_p9), %v791_v55, %v790_v52  ;;  %v774_v58 = vld [vmem:[#allocation2 + $0x40] sm:$0xff] (%p759_p9)  ;;  %v775_v3 = vld [vmem:[#allocation2 + $0x48] sm:$0xff] (%p759_p9)  ;;  %v793_v5 = vld [vmem:[#allocation2 + $0xd8] sm:$0xff] (%p759_p9)  ;;  %p1549_p10 = pnand (%p759_p9), %p1548_p5, %p2510_p6  ;;  %s1553_s18 = scalar_lea.vmem (%p759_p9), %s1552_s30, 8192 }
 0x13e   : > { %v1345_v48 = vpack.c.bf16 %v775_v3, %v774_v58  ;;  %v1347_v60 = vpack.c.bf16 %v793_v5, %v792_v4  ;;  %v776_v16 = vld [vmem:[#allocation2 + $0x50] sm:$0xff]  ;;  %v777_v17 = vld [vmem:[#allocation2 + $0x58] sm:$0xff]  ;;  %v794_v18 = vld [vmem:[#allocation2 + $0xe0] sm:$0xff]  ;;  %p1554_p8 = scmp.lt.s32.totalorder %s2403_s14, %s1552_s30  ;;  %p1555_p1 = scmp.lt.s32.totalorder %s1553_s18, %s1547_s23 }
 0x13f   : > { %v795_v19 = vld [vmem:[#allocation2 + $0xe8] sm:$0xff]  ;;  %v1349_v20 = vpack.c.bf16 %v777_v17, %v776_v16  ;;  %v778_v22 = vld [vmem:[#allocation2 + $0x60] sm:$0xff]  ;;  %v780_v1 = vld [vmem:[#allocation2 + $0x70] sm:$0xff]  ;;  %v981_v16 = vsub.s32 6, %v2024_v46  ;;  %p1550_p13 = pneg %p1549_p10 }
 0x140   : > { %v1351_v21 = vpack.c.bf16 %v795_v19, %v794_v18  ;;  %v779_v23 = vld [vmem:[#allocation2 + $0x68] sm:$0xff]  ;;  %v781_v50 = vld [vmem:[#allocation2 + $0x78] sm:$0xff]  ;;  %v800_v2 = vld [vmem:[%s2477_s3 + $0x10] sm:$0xff]  ;;  %p1556_p2 = por %p1555_p1, %p1554_p8 }
 0x141   : > { %v1353_v54 = vpack.c.bf16 %v779_v23, %v778_v22  ;;  %v807_v0 = vld [vmem:[%s2477_s3 + $0x48] sm:$0xff]  ;;  %v808_v52 = vld [vmem:[%s2477_s3 + $0x50] sm:$0xff]  ;;  %v802_v55 = vld [vmem:[%s2477_s3 + $0x20] sm:$0xff]  ;;  %v982_v18 = vrot.slane %v2015_v34, %v981_v16 }
 0x142   : > { %1334 = vmatpush3.bf16.xpose.msra.mxu0 %v1333_v24  ;;  %1368 = vmatpush3.bf16.xpose.msra.mxu1 %v1333_v24  ;;  %v796_v24 = vld [vmem:[#allocation2 + $0xf0] sm:$0xff]  ;;  %v811_v58 = vld [vmem:[%s2477_s3 + $0x68] sm:$0xff]  ;;  %v805_v5 = vld [vmem:[%s2477_s3 + $0x38] sm:$0xff]  ;;  %p1557_p11 = pnand %p1556_p2, %p1550_p13 }
 0x143   : > { %1336 = vmatprep.subr.bf16.mxu0 %v1335_v53  ;;  %1361 = vmatprep.subr.bf16.mxu1 %v1335_v53  ;;  %v797_v53 = vld [vmem:[#allocation2 + $0xf8] sm:$0xff]  ;;  %v804_v3 = vld [vmem:[%s2477_s3 + $0x30] sm:$0xff] }
 0x144   : > { %v1355_v49 = vpack.c.bf16 %v797_v53, %v796_v24  ;;  %v812_v4 = vld [vmem:[%s2477_s3 + $0x70] sm:$0xff] }
 0x14a   : > { %1338 = vmatpush3.bf16.xpose.msra.mxu0 %v1337_v63  ;;  %1369 = vmatpush3.bf16.xpose.msra.mxu1 %v1337_v63  ;;  %v1357_v63 = vpack.c.bf16 %v781_v50, %v780_v1 }
 0x14b   : > { %1340 = vmatprep.subr.bf16.mxu0 %v1339_v51  ;;  %1362 = vmatprep.subr.bf16.mxu1 %v1339_v51  ;;  %v799_v51 = vld [vmem:[%s2477_s3 + $0x8] sm:$0xff] }
 0x152   : > { %1342 = vmatpush3.bf16.xpose.msra.mxu0 %v1341_v56  ;;  %1370 = vmatpush3.bf16.xpose.msra.mxu1 %v1341_v56  ;;  %v810_v56 = vld [vmem:[%s2477_s3 + $0x60] sm:$0xff] }
 0x153   : > { %1344 = vmatprep.subr.bf16.mxu0 %v1343_v57  ;;  %1363 = vmatprep.subr.bf16.mxu1 %v1343_v57  ;;  %v803_v57 = vld [vmem:[%s2477_s3 + $0x28] sm:$0xff] }
 0x15a   : > { %1346 = vmatpush3.bf16.xpose.msra.mxu0 %v1345_v48  ;;  %1371 = vmatpush3.bf16.xpose.msra.mxu1 %v1345_v48  ;;  %v813_v48 = vld [vmem:[%s2477_s3 + $0x78] sm:$0xff] }
 0x15b   : > { %1348 = vmatprep.subr.bf16.mxu0 %v1347_v60  ;;  %1364 = vmatprep.subr.bf16.mxu1 %v1347_v60  ;;  %v977_v60 = vsub.s32 2, %v2024_v46 }
 0x15d   : > { %v978_v17 = vrot.slane %v2015_v34, %v977_v60 }
 0x15f   : > { %v2298_v19 = vrot.slane %v978_v17, %v977_v60 }
 0x162   : > { %1350 = vmatpush3.bf16.xpose.msra.mxu0 %v1349_v20  ;;  %1372 = vmatpush3.bf16.xpose.msra.mxu1 %v1349_v20  ;;  %v2300_v20 = vrot.slane %v982_v18, %v977_v60 }
 0x163   : > { %1352 = vmatprep.subr.bf16.mxu0 %v1351_v21  ;;  %1365 = vmatprep.subr.bf16.mxu1 %v1351_v21 }
 0x16a   : > { %1354 = vmatpush3.bf16.xpose.msra.mxu0 %v1353_v54  ;;  %1373 = vmatpush3.bf16.xpose.msra.mxu1 %v1353_v54 }
 0x16b   : > { %1356 = vmatprep.subr.bf16.mxu0 %v1355_v49  ;;  %1366 = vmatprep.subr.bf16.mxu1 %v1355_v49 }
 0x172   : > { %1358 = vmatpush3.bf16.xpose.msra.mxu0 %v1357_v63  ;;  %1374 = vmatpush3.bf16.xpose.msra.mxu1 %v1357_v63 }
 0x179   : > { %1296 = vmatmul.mubr.f32.vlgmr.msra.gmra.mrb[0].mxu0 %v2241_v36  ;;  %1312 = vmatmul.mubr.f32.vlgmr.msra.gmra.mrb[0].mxu1 %v2247_v37  ;;  %v801_v36 = vld [vmem:[%s2477_s3 + $0x18] sm:$0xff] }
 0x17a   : > { %1297 = vmatprep.mubr.f32.mxu0 %v799_v51  ;;  %1313 = vmatprep.mubr.f32.mxu1 %v807_v0  ;;  %v809_v37 = vld [vmem:[%s2477_s3 + $0x58] sm:$0xff] }
 0x17d   : > { %1298 = vmatmul.mubr.f32.gmra.mrb[2].mxu0 %v799_v51  ;;  %1314 = vmatmul.mubr.f32.gmra.mrb[2].mxu1 %v807_v0 }
 0x17e   : > { %1299 = vmatprep.mubr.f32.mxu0 %v800_v2  ;;  %1315 = vmatprep.mubr.f32.mxu1 %v808_v52 }
 0x181   : > { %1300 = vmatmul.mubr.f32.gmra.mrb[4].mxu0 %v800_v2  ;;  %1316 = vmatmul.mubr.f32.gmra.mrb[4].mxu1 %v808_v52 }
 0x182   : > { %1301 = vmatprep.mubr.f32.mxu0 %v801_v36  ;;  %1317 = vmatprep.mubr.f32.mxu1 %v809_v37 }
 0x185   : > { %1302 = vmatmul.mubr.f32.gmra.mrb[6].mxu0 %v801_v36  ;;  %1318 = vmatmul.mubr.f32.gmra.mrb[6].mxu1 %v809_v37 }
 0x186   : > { %1303 = vmatprep.mubr.f32.mxu0 %v802_v55  ;;  %1319 = vmatprep.mubr.f32.mxu1 %v810_v56 }
 0x189   : > { %1304 = vmatmul.mubr.f32.gmra.mrb[8].mxu0 %v802_v55  ;;  %1320 = vmatmul.mubr.f32.gmra.mrb[8].mxu1 %v810_v56 }
 0x18a   : > { %1305 = vmatprep.mubr.f32.mxu0 %v803_v57  ;;  %1321 = vmatprep.mubr.f32.mxu1 %v811_v58 }
 0x18d   : > { %1306 = vmatmul.mubr.f32.gmra.mrb[10].mxu0 %v803_v57  ;;  %1322 = vmatmul.mubr.f32.gmra.mrb[10].mxu1 %v811_v58 }
 0x18e   : > { %1307 = vmatprep.mubr.f32.mxu0 %v804_v3  ;;  %1323 = vmatprep.mubr.f32.mxu1 %v812_v4 }
 0x191   : > { %1308 = vmatmul.mubr.f32.gmra.mrb[12].mxu0 %v804_v3  ;;  %1324 = vmatmul.mubr.f32.gmra.mrb[12].mxu1 %v812_v4 }
 0x192   : > { %1309 = vmatprep.mubr.f32.mxu0 %v805_v5  ;;  %1325 = vmatprep.mubr.f32.mxu1 %v813_v48 }
 0x195   : > { %1310 = vmatmul.mubr.f32.gmra.mrb[14].mxu0 %v805_v5  ;;  %1326 = vmatmul.mubr.f32.gmra.mrb[14].mxu1 %v813_v48 }
 0x24c   : > { %v880_v21 = vpop.f32.mrb[0].mxu0  ;;  %v928_v22 = vpop.f32.mrb[0].mxu1 }
 0x24d   : > { %v993_v23 = vmul.f32 %v2298_v19, %v880_v21  ;;  %v1009_v24 = vmul.f32 %v2298_v19, %v928_v22  ;;  %v882_v53 = vpop.f32.mrb[1].mxu0  ;;  %v930_v54 = vpop.f32.mrb[1].mxu1 }
 0x24e   : > { %v994_v46 = vmul.f32 %v2300_v20, %v882_v53  ;;  %v1010_v34 = vmul.f32 %v2300_v20, %v930_v54 }
 0x24f   : > { %v1025_v49 = vadd.f32 %v993_v23, %v2076_v31  ;;  %v1041_v1 = vadd.f32 %v1009_v24, %v2170_v35 }
 0x250   : > { %v1026_v50 = vadd.f32 %v994_v46, %v2078_v32  ;;  %v1042_v63 = vadd.f32 %v1010_v34, %v2172_v45  ;;  %v886_v51 = vpop.f32.mrb[2].mxu0  ;;  %v934_v0 = vpop.f32.mrb[2].mxu1 }
 0x251   : > { %1057 = vst [vmem:[%s1912_s9] sm:$0xff] %v1025_v49  ;;  %1073 = vst [vmem:[%s1912_s9 + $0x80] sm:$0xff] %v1041_v1  ;;  %v995_v2 = vmul.f32 %v2298_v19, %v886_v51  ;;  %v1011_v52 = vmul.f32 %v2298_v19, %v934_v0  ;;  %v888_v36 = vpop.f32.mrb[3].mxu0  ;;  %v936_v37 = vpop.f32.mrb[3].mxu1 }
 0x252   : > { %1058 = vst [vmem:[%s1912_s9 + $0x8] sm:$0xff] %v1026_v50  ;;  %1074 = vst [vmem:[%s1912_s9 + $0x88] sm:$0xff] %v1042_v63  ;;  %v996_v31 = vmul.f32 %v2300_v20, %v888_v36  ;;  %v1012_v32 = vmul.f32 %v2300_v20, %v936_v37 }
 0x253   : > { %v1027_v35 = vadd.f32 %v995_v2, %v2072_v29  ;;  %v1043_v45 = vadd.f32 %v1011_v52, %v2166_v44 }
 0x254   : > { %v1028_v55 = vadd.f32 %v996_v31, %v2074_v30  ;;  %v1044_v56 = vadd.f32 %v1012_v32, %v2168_v33  ;;  %v892_v57 = vpop.f32.mrb[4].mxu0  ;;  %v940_v58 = vpop.f32.mrb[4].mxu1 }
 0x255   : > { %1059 = vst [vmem:[%s1912_s9 + $0x10] sm:$0xff] %v1027_v35  ;;  %1075 = vst [vmem:[%s1912_s9 + $0x90] sm:$0xff] %v1043_v45  ;;  %v997_v3 = vmul.f32 %v2298_v19, %v892_v57  ;;  %v1013_v4 = vmul.f32 %v2298_v19, %v940_v58  ;;  %v894_v5 = vpop.f32.mrb[5].mxu0  ;;  %v942_v48 = vpop.f32.mrb[5].mxu1 }
 0x256   : > { %1060 = vst [vmem:[%s1912_s9 + $0x18] sm:$0xff] %v1028_v55  ;;  %1076 = vst [vmem:[%s1912_s9 + $0x98] sm:$0xff] %v1044_v56  ;;  %v998_v29 = vmul.f32 %v2300_v20, %v894_v5  ;;  %v1014_v30 = vmul.f32 %v2300_v20, %v942_v48 }
 0x257   : > { %v1029_v44 = vadd.f32 %v997_v3, %v2103_v10  ;;  %v1045_v33 = vadd.f32 %v1013_v4, %v2199_v14 }
 0x258   : > { %v1030_v60 = vadd.f32 %v998_v29, %v2105_v11  ;;  %v1046_v16 = vadd.f32 %v1014_v30, %v2201_v15  ;;  %v898_v17 = vpop.f32.mrb[6].mxu0  ;;  %v946_v18 = vpop.f32.mrb[6].mxu1 }
 0x259   : > { %1061 = vst [vmem:[%s1912_s9 + $0x20] sm:$0xff] %v1029_v44  ;;  %1077 = vst [vmem:[%s1912_s9 + $0xa0] sm:$0xff] %v1045_v33  ;;  %v999_v21 = vmul.f32 %v2298_v19, %v898_v17  ;;  %v1015_v22 = vmul.f32 %v2298_v19, %v946_v18  ;;  %v900_v23 = vpop.f32.mrb[7].mxu0  ;;  %v948_v24 = vpop.f32.mrb[7].mxu1 }
 0x25a   : > { %1062 = vst [vmem:[%s1912_s9 + $0x28] sm:$0xff] %v1030_v60  ;;  %1078 = vst [vmem:[%s1912_s9 + $0xa8] sm:$0xff] %v1046_v16  ;;  %v1000_v10 = vmul.f32 %v2300_v20, %v900_v23  ;;  %v1016_v11 = vmul.f32 %v2300_v20, %v948_v24 }
 0x25b   : > { %v1031_v14 = vadd.f32 %v999_v21, %v2099_v8  ;;  %v1047_v15 = vadd.f32 %v1015_v22, %v2195_v12 }
 0x25c   : > { %v1032_v53 = vadd.f32 %v1000_v10, %v2101_v9  ;;  %v1048_v54 = vadd.f32 %v1016_v11, %v2197_v13  ;;  %v904_v46 = vpop.f32.mrb[8].mxu0  ;;  %v952_v34 = vpop.f32.mrb[8].mxu1 }
 0x25d   : > { %1063 = vst [vmem:[%s1912_s9 + $0x30] sm:$0xff] %v1031_v14  ;;  %1079 = vst [vmem:[%s1912_s9 + $0xb0] sm:$0xff] %v1047_v15  ;;  %v1001_v49 = vmul.f32 %v2298_v19, %v904_v46  ;;  %v1017_v1 = vmul.f32 %v2298_v19, %v952_v34  ;;  %v906_v50 = vpop.f32.mrb[9].mxu0  ;;  %v954_v63 = vpop.f32.mrb[9].mxu1 }
 0x25e   : > { %1064 = vst [vmem:[%s1912_s9 + $0x38] sm:$0xff] %v1032_v53  ;;  %1080 = vst [vmem:[%s1912_s9 + $0xb8] sm:$0xff] %v1048_v54  ;;  %v1002_v8 = vmul.f32 %v2300_v20, %v906_v50  ;;  %v1018_v9 = vmul.f32 %v2300_v20, %v954_v63 }
 0x25f   : > { %v1033_v12 = vadd.f32 %v1001_v49, %v2122_v27  ;;  %v1049_v13 = vadd.f32 %v1017_v1, %v2218_v40 }
 0x260   : > { %v1034_v51 = vadd.f32 %v1002_v8, %v2124_v28  ;;  %v1050_v0 = vadd.f32 %v1018_v9, %v2220_v43  ;;  %v910_v2 = vpop.f32.mrb[10].mxu0  ;;  %v958_v52 = vpop.f32.mrb[10].mxu1 }
 0x261   : > { %1065 = vst [vmem:[%s1912_s9 + $0x40] sm:$0xff] %v1033_v12  ;;  %1081 = vst [vmem:[%s1912_s9 + $0xc0] sm:$0xff] %v1049_v13  ;;  %v1003_v36 = vmul.f32 %v2298_v19, %v910_v2  ;;  %v1019_v37 = vmul.f32 %v2298_v19, %v958_v52  ;;  %v912_v31 = vpop.f32.mrb[11].mxu0  ;;  %v960_v32 = vpop.f32.mrb[11].mxu1 }
 0x262   : > { %1066 = vst [vmem:[%s1912_s9 + $0x48] sm:$0xff] %v1034_v51  ;;  %1082 = vst [vmem:[%s1912_s9 + $0xc8] sm:$0xff] %v1050_v0  ;;  %v1004_v27 = vmul.f32 %v2300_v20, %v912_v31  ;;  %v1020_v28 = vmul.f32 %v2300_v20, %v960_v32 }
 0x263   : > { %v1035_v40 = vadd.f32 %v1003_v36, %v2118_v25  ;;  %v1051_v43 = vadd.f32 %v1019_v37, %v2214_v38 }
 0x264   : > { %v1036_v35 = vadd.f32 %v1004_v27, %v2120_v26  ;;  %v1052_v45 = vadd.f32 %v1020_v28, %v2216_v39  ;;  %v916_v55 = vpop.f32.mrb[12].mxu0  ;;  %v964_v56 = vpop.f32.mrb[12].mxu1 }
 0x265   : > { %1067 = vst [vmem:[%s1912_s9 + $0x50] sm:$0xff] %v1035_v40  ;;  %1083 = vst [vmem:[%s1912_s9 + $0xd0] sm:$0xff] %v1051_v43  ;;  %v1005_v57 = vmul.f32 %v2298_v19, %v916_v55  ;;  %v1021_v58 = vmul.f32 %v2298_v19, %v964_v56  ;;  %v918_v25 = vpop.f32.mrb[13].mxu0  ;;  %v966_v38 = vpop.f32.mrb[13].mxu1 }
 0x266   : > { %1068 = vst [vmem:[%s1912_s9 + $0x58] sm:$0xff] %v1036_v35  ;;  %1084 = vst [vmem:[%s1912_s9 + $0xd8] sm:$0xff] %v1052_v45  ;;  %v1006_v26 = vmul.f32 %v2300_v20, %v918_v25  ;;  %v1022_v39 = vmul.f32 %v2300_v20, %v966_v38 }
 0x267   : > { %v1037_v3 = vadd.f32 %v1005_v57, %v2151_v7  ;;  %v1053_v4 = vadd.f32 %v1021_v58, %v2234_v62 }
 0x268   : > { %v1038_v5 = vadd.f32 %v1006_v26, %v2153_v42  ;;  %v1054_v48 = vadd.f32 %v1022_v39, %v2236_v59  ;;  %v922_v29 = vpop.f32.mrb[14].mxu0  ;;  %v970_v30 = vpop.f32.mrb[14].mxu1 }
 0x269   : > { %1069 = vst [vmem:[%s1912_s9 + $0x60] sm:$0xff] %v1037_v3  ;;  %1085 = vst [vmem:[%s1912_s9 + $0xe0] sm:$0xff] %v1053_v4  ;;  %v1007_v44 = vmul.f32 %v2298_v19, %v922_v29  ;;  %v1023_v33 = vmul.f32 %v2298_v19, %v970_v30  ;;  %v924_v7 = vpop.f32.mrb[15].mxu0  ;;  %v972_v62 = vpop.f32.mrb[15].mxu1 }
 0x26a   : > { %1070 = vst [vmem:[%s1912_s9 + $0x68] sm:$0xff] %v1038_v5  ;;  %1086 = vst [vmem:[%s1912_s9 + $0xe8] sm:$0xff] %v1054_v48  ;;  %v1008_v42 = vmul.f32 %v2300_v20, %v924_v7  ;;  %v1024_v59 = vmul.f32 %v2300_v20, %v972_v62 }
 0x26b   : > { %v1039_v60 = vadd.f32 %v1007_v44, %v2147_v41  ;;  %v1055_v19 = vadd.f32 %v1023_v33, %v2230_v61 }
 0x26c   : > { %v1040_v16 = vadd.f32 %v1008_v42, %v2149_v6  ;;  %v1056_v17 = vadd.f32 %v1024_v59, %v2232_v47 }
 0x26d   : > { %1071 = vst [vmem:[%s1912_s9 + $0x70] sm:$0xff] %v1039_v60  ;;  %1087 = vst [vmem:[%s1912_s9 + $0xf0] sm:$0xff] %v1055_v19 }
 0x26e   : > { %1072 = vst [vmem:[%s1912_s9 + $0x78] sm:$0xff] %v1040_v16  ;;  %1088 = vst [vmem:[%s1912_s9 + $0xf8] sm:$0xff] %v1056_v17 }
 0x26f   : > { %1560 = shalt.err (!%p1557_p11)
}
 0x270   : > { %s1561_s9 = scalar_lea.hbm %s2399_s26, 4096  ;;  %s1565_s16 = scalar_lea.hbm %s2481_s7, 16384 }
 0x271   : > { %p1562_p0 = scmp.ne.s32.totalorder %s2399_s26, %s1561_s9  ;;  %p1566_p7 = scmp.lt.u32.totalorder %s2399_s26, %s2481_s7 }
 0x272   : > { %p1567_p12 = scmp.lt.u32.totalorder %s1565_s16, %s1561_s9  ;;  %p1569_p5 = scmp.lt.u32.totalorder %s1561_s9, %s2399_s26 }
 0x273   : > { %p1563_p4 = pnand %p1562_p0, %p2510_p6 }
 0x274   : > { %p1568_p9 = por %p1567_p12, %p1566_p7 }
 0x275   : > { %p1564_p3 = pneg %p1563_p4 }
 0x276   : > { %p1570_p10 = por %p1569_p5, %p1568_p9 }
 0x278   : > { %p1571_p13 = pnand %p1570_p10, %p1564_p3 }
 0x27a   : > { %1574 = shalt.err (!%p1571_p13)
}
 0x27b   : > { %s1698_s17 = smov 256   ;;  %s1699_s25 = smov 512  }
 0x27c   : > { %s1700_s12 = smov 16  }
 0x27d   : > { %1377 = dma.vmem_to_hbm [thread:$0]  (%p2510_p6), %s2403_s14, 4096, %s2399_s26, %s2413_s28, %s1698_s17, %s1699_s25, %s1700_s12  }
 0x27e PF: > { %s2511_s24 = sld [smem:[#allocation24_spill]]  ;;  %p1388_p8 = scmp.ge.s32.totalorder %s1681_s15, 2 }
 0x27f   : > { %s1120_s11 = sand.u32 1, %s1641_s29  }
 0x280   : > { %s1121_s21 = scalar_lea.sflag [#allocation8], %s1120_s11 }
 0x284   : > { %p2512_p1 = scmp.ne.s32.totalorder %s2511_s24, 0 }
 0x286   : > { %p1384_p2 = pnand %p1388_p8, %p2512_p1 }
 0x288   : > { %1636 = dma.done.wait (!%p1384_p2), %s1121_s21, 4096  }
 0x289   : > { %1638 = vsyncadd (!%p1384_p2), %s1121_s21, 4294963200  ;;  %s29_s15 = sadd.s32 1, %s1681_s15   ;;  %s2513_s10 = sld [smem:[#allocation15_spill]] }
 0x28a   : > { %p26_p11 = scmp.ge.s32.totalorder %s29_s15, 6   ;;  %s2514_s30 = sld [smem:[#allocation23_spill]] }
 0x28b   : > { %s2515_s8 = sld [smem:[#allocation16_spill]]  ;;  %s2516_s9 = sld [smem:[#allocation17_spill]] }
 0x28c   : > { %s2517_s27 = sld [smem:[#allocation22_spill]]  ;;  %s2518_s11 = sld [smem:[#allocation18_spill]] }
 0x28d   : > { %s2519_s12 = sld [smem:[#allocation19_spill]]  ;;  %s2520_s13 = sld [smem:[#allocation20_spill]] }
 0x28e   : > { %s2521_s14 = sld [smem:[#allocation21_spill]]  ;;  %s2522_s29 = smov %s1645_s0 }
 0x28f   : > { %s2523_s0 = smov %s2513_s10  ;;  %28 = sbr.rel (!%p26_p11) target bundleno = 24 (0x18), region = 166 }
 0x292   : > { %s2524_s10 = smov %s2517_s27 }
 0x296   :  { %1126 = vsyncpa [#allocation7], 1 }
 0x297   :  { %1128 = vsyncpa [#allocation7 + $0x1], 1 }
 0x298   :  { %1129 = vsyncpa [#allocation8], 1 }
 0x299   :  { %1131 = vsyncpa [#allocation8 + $0x1], 1 }
 0x29a   :  { %1132 = vsyncmov [#allocation3] }
 0x29d   :  { %s1133_s26 = vpop.sfrf %1132 }
 0x29e   :  { %p1261_p6 = scmp.ne.s32.totalorder %s1133_s26, 0 }
 0x2a0   :  { %1137 = shalt.err (%p1261_p6)  }

</bundles_post_ra>
